<compile_context>
chip_gen: v7x
topology: tpu7x:2x2x1
jax: 0.10.0
libtpu: 0.0.40
codegen_flags: <defaults>
</compile_context>

<pallas_src>
import functools

import jax
import jax.numpy as jnp
import numpy as np
from jax.experimental import pallas as pl
from jax.experimental.pallas import tpu as pltpu


# --------------------------------------------------------------------------
# Positional-encoding table (fixed buffer, built once; mirrors __init__).
# --------------------------------------------------------------------------
def make_pe(d_model, max_len=5000, dtype=jnp.float32):
    position = np.arange(0, max_len, dtype=np.float64)[:, None]           # (L, 1)
    div_term = 1.0 / 10000.0 ** (2.0 * np.arange(d_model) / d_model)      # (D,)
    pe = np.zeros((max_len, d_model), dtype=np.float64)
    pe[:, 0::2] = np.sin(position * div_term[0::2])   # same (non-canonical) slicing as spec
    pe[:, 1::2] = np.cos(position * div_term[1::2])
    return jnp.asarray(pe, dtype=dtype)                                    # (L, D)


# --------------------------------------------------------------------------
# Kernels
# --------------------------------------------------------------------------
def _add_pe_3d_kernel(x_ref, pe_ref, o_ref):
    # x_ref/o_ref: (ts, B, D) with B sublane-aligned and D lane-aligned.
    # pe_ref: (ts, D); broadcast over the batch (sublane) axis in VMEM.
    pe = pe_ref[...].astype(o_ref.dtype)
    o_ref[...] = x_ref[...] + pe[:, None, :]


def _add_pe_2d_kernel(x_ref, pe_ref, o_ref, *, batch, d_model):
    # x_ref/o_ref: (ts, B*D) flattened; pe_ref: (ts, D).
    # Replicate pe across the batch with static ref slices: no HBM pre-tiling
    # (removes ~50% extra read traffic) and no concat/reshape lowering hazards.
    # The unroll is small since this path is only taken for sublane-unaligned B.
    pe = pe_ref[...].astype(o_ref.dtype)
    for b in range(batch):
        sl = slice(b * d_model, (b + 1) * d_model)
        o_ref[:, sl] = x_ref[:, sl] + pe


# --------------------------------------------------------------------------
# Wrapper
# --------------------------------------------------------------------------
_MIB = 1024 * 1024
_TARGET_X_TILE_BYTES = 6 * _MIB      # ~6 MiB x tile: good on v7x, safe everywhere


def _round_up(a, b):
    return (a + b - 1) // b * b


def _sublane_pack(dtype):
    # Rows packed per 32-bit sublane word: f32 -> 8, bf16/f16 -> 16, int8 -> 32.
    return 32 // jnp.dtype(dtype).itemsize


def _seq_tile(seq_len, padded_row_bytes, pack):
    """Sequence tile: <= ~6 MiB of *padded* x, pack-aligned, >= 2 grid steps."""
    target = max(1, _TARGET_X_TILE_BYTES // max(padded_row_bytes, 1))
    cap = -(-seq_len // 2)            # ceil(S/2): >= 2 steps for v7x's two TCs
    ts = min(target, cap, seq_len)
    return max(pack, ts // pack * pack)


def positional_encoding(x, pe_full):
    """x: (S, B, D); pe_full: (max_len, D). Returns x + pe_full[:S] broadcast over B."""
    S, B, D = x.shape
    max_len, d_pe = pe_full.shape
    assert d_pe == D and S <= max_len

    x_item = jnp.dtype(x.dtype).itemsize
    pe_item = jnp.dtype(pe_full.dtype).itemsize
    pack = _sublane_pack(x.dtype)
    use_3d = (B % pack == 0) and (D % 128 == 0)

    # Padding-aware bytes of one x/out row in VMEM (review: account for layout).
    if use_3d:
        padded_row = _round_up(B, pack) * _round_up(D, 128) * x_item
    else:
        padded_row = _round_up(B * D, 128) * x_item

    tiny = S < pack
    if tiny:
        ts = S
        pe_in = pe_full[:S]            # tiny slice so the pe block == full dims
    else:
        ts = _seq_tile(S, padded_row, pack)
        pe_in = pe_full                # untouched; index_map reads only rows < S
    grid = (pl.cdiv(S, ts),)

    # Double-buffered VMEM footprint of the live tiles (x_in + out + pe).
    pe_tile_bytes = _round_up(max(ts, 8), 8) * _round_up(D, 128) * pe_item
    footprint = 2 * (2 * ts * padded_row + pe_tile_bytes)
    vmem_limit = int(min(64 * _MIB, max(footprint + 4 * _MIB, 16 * _MIB)))

    compiler_params = pltpu.CompilerParams(
        dimension_semantics=("parallel",),      # v7x: both TensorCores stream
        vmem_limit_bytes=vmem_limit,
    )
    cost = pl.CostEstimate(
        flops=S * B * D,
        transcendentals=0,
        bytes_accessed=2 * S * B * D * x_item + grid[0] * ts * D * pe_item,
    )

    if use_3d:
        # Lane- and sublane-dense 3-D path (B % pack == 0, D % 128 == 0).
        return pl.pallas_call(
            _add_pe_3d_kernel,
            out_shape=jax.ShapeDtypeStruct((S, B, D), x.dtype),
            grid=grid,
            in_specs=[
                pl.BlockSpec((ts, B, D), lambda i: (i, 0, 0)),
                pl.BlockSpec((ts, D), lambda i: (i, 0)),
            ],
            out_specs=pl.BlockSpec((ts, B, D), lambda i: (i, 0, 0)),
            compiler_params=compiler_params,
            cost_estimate=cost,
        )(x, pe_in)

    # Flattened (S, B*D) path: sublane axis = sequence (always dense), lane axis
    # = B*D (full dim).  The reshape is a free row-major view.
    x2 = x.reshape(S, B * D)
    kernel = functools.partial(_add_pe_2d_kernel, batch=B, d_model=D)
    out2 = pl.pallas_call(
        kernel,
        out_shape=jax.ShapeDtypeStruct((S, B * D), x.dtype),
        grid=grid,
        in_specs=[
            pl.BlockSpec((ts, B * D), lambda i: (i, 0)),
            pl.BlockSpec((ts, D), lambda i: (i, 0)),
        ],
        out_specs=pl.BlockSpec((ts, B * D), lambda i: (i, 0)),
        compiler_params=compiler_params,
        cost_estimate=cost,
    )(x2, pe_in)
    return out2.reshape(S, B, D)


if __name__ == "__main__":
    key = jax.random.PRNGKey(0)

    # 1) Small (seq, batch, d_model) consistent with the module: 2-D flattened path.
    S, B, D = 8, 2, 32
    pe_full = make_pe(D, max_len=5000)
    x = jax.random.normal(key, (S, B, D), dtype=jnp.float32)
    out = jax.block_until_ready(positional_encoding(x, pe_full))
    ref = np.asarray(x) + np.asarray(pe_full[:S])[:, None, :]
    np.testing.assert_allclose(np.asarray(out), ref, rtol=1e-6, atol=1e-6)

    # 2) Sublane/lane-aligned shapes: 3-D path, >= 2 grid steps.
    S2, B2, D2 = 16, 8, 128
    pe_full2 = make_pe(D2, max_len=5000)
    x2 = jax.random.normal(jax.random.PRNGKey(0), (S2, B2, D2), dtype=jnp.float32)
    out2 = jax.block_until_ready(positional_encoding(x2, pe_full2))
    ref2 = np.asarray(x2) + np.asarray(pe_full2[:S2])[:, None, :]
    np.testing.assert_allclose(np.asarray(out2), ref2, rtol=1e-6, atol=1e-6)

    # 3) Unaligned sequence length: partial trailing block + multi-step grid.
    S3, B3, D3 = 40, 2, 32
    x3 = jax.random.normal(jax.random.PRNGKey(0), (S3, B3, D3), dtype=jnp.float32)
    out3 = jax.block_until_ready(positional_encoding(x3, pe_full))
    ref3 = np.asarray(x3) + np.asarray(pe_full[:S3])[:, None, :]
    np.testing.assert_allclose(np.asarray(out3), ref3, rtol=1e-6, atol=1e-6)

    # 4) bf16 input (S < sublane pack): tiny-S path + in-kernel pe cast.
    x4 = jax.random.normal(jax.random.PRNGKey(0), (S, B, D), dtype=jnp.bfloat16)
    out4 = jax.block_until_ready(positional_encoding(x4, pe_full))
    ref4 = np.asarray(x4, dtype=np.float32) + np.asarray(pe_full[:S])[:, None, :]
    np.testing.assert_allclose(np.asarray(out4, dtype=np.float32), ref4,
                               rtol=3e-2, atol=3e-2)

    print("KERNEL_OK")
</pallas_src>

<mosaic_0001>
module attributes {stable_mosaic.version = 11 : i64} {
  func.func @_add_pe_2d_kernel(%arg0: i32, %arg1: memref<8x64xf32, #tpu.memory_space<vmem>>, %arg2: memref<8x32xf32, #tpu.memory_space<vmem>>, %arg3: memref<8x64xf32, #tpu.memory_space<vmem>>) attributes {dimension_semantics = [#tpu.dimension_semantics<parallel>], iteration_bounds = array<i64: 1>, scalar_prefetch = 0 : i64, scratch_operands = 0 : i64, tpu.core_type = #tpu.core_type<tc>, window_params = [{transform_indices = @transform_0, window_bounds = array<i64: 8, 64>}, {transform_indices = @transform_1, window_bounds = array<i64: 8, 32>}, {transform_indices = @transform_2, window_bounds = array<i64: 8, 64>}]} {
    %c0 = arith.constant 0 : index
    %c0_0 = arith.constant 0 : index
    %0 = vector.load %arg2[%c0, %c0_0] : memref<8x32xf32, #tpu.memory_space<vmem>>, vector<8x32xf32>
    %c0_1 = arith.constant 0 : index
    %c0_2 = arith.constant 0 : index
    %1 = vector.load %arg1[%c0_1, %c0_2] : memref<8x64xf32, #tpu.memory_space<vmem>>, vector<8x32xf32>
    %2 = arith.addf %1, %0 : vector<8x32xf32>
    %c0_3 = arith.constant 0 : index
    %c0_4 = arith.constant 0 : index
    %3 = vector.load %arg3[%c0_3, %c0_4] : memref<8x64xf32, #tpu.memory_space<vmem>>, vector<8x32xf32>
    tpu.vector_store %arg3[%c0_3, %c0_4], %2 {strides = array<i32>} : memref<8x64xf32, #tpu.memory_space<vmem>>, vector<8x32xf32>,
    %c0_5 = arith.constant 0 : index
    %c32 = arith.constant 32 : index
    %4 = vector.load %arg1[%c0_5, %c32] : memref<8x64xf32, #tpu.memory_space<vmem>>, vector<8x32xf32>
    %5 = arith.addf %4, %0 : vector<8x32xf32>
    %c0_6 = arith.constant 0 : index
    %c32_7 = arith.constant 32 : index
    %6 = vector.load %arg3[%c0_6, %c32_7] : memref<8x64xf32, #tpu.memory_space<vmem>>, vector<8x32xf32>
    tpu.vector_store %arg3[%c0_6, %c32_7], %5 {strides = array<i32>} : memref<8x64xf32, #tpu.memory_space<vmem>>, vector<8x32xf32>,
    return
  }
  func.func @transform_0(%arg0: i32) -> (i32, i32) {
    %c0_i32 = arith.constant 0 : i32
    %c0_i32_0 = arith.constant 0 : i32
    return %arg0, %c0_i32 : i32, i32
  }
  func.func @transform_1(%arg0: i32) -> (i32, i32) {
    %c0_i32 = arith.constant 0 : i32
    %c0_i32_0 = arith.constant 0 : i32
    return %arg0, %c0_i32 : i32, i32
  }
  func.func @transform_2(%arg0: i32) -> (i32, i32) {
    %c0_i32 = arith.constant 0 : i32
    %c0_i32_0 = arith.constant 0 : i32
    return %arg0, %c0_i32 : i32, i32
  }
}

</mosaic_0001>

<bundles_post_ra>
// kernel: tpu_custom_call.1
= control target key start
LH: loop header
LB: loop body
LE: loop exit
PB: predicated region body
PF: predicated region fallthrough
CT: control target
= control target key end

     0   :  { %vm15_vm0 = vcmask 261120   ;;  %s100_s0 = inlined_call_operand.vmem [shape: f32[8,64], index: 0, kind: input, shape index: {}]   ;;  %s101_s1 = inlined_call_operand.vmem [shape: f32[5000,32], index: 1, kind: input, shape index: {}]   ;;  %s102_s2 = inlined_call_operand.hbm [shape: f32[8,64], index: 2, kind: output, shape index: {}]  }
   0x1   :  { %v12_v0 = vld [vmem:[%s101_s1] sm:$0xff] }
   0x2   :  { %v13_v1 = vld [vmem:[%s100_s0] sm:$0xff] }
   0x3   :  { %7 = vsyncpa [#allocation3], 0  ;;  %v14_v2 = vadd.f32 %v13_v1, %v12_v0  ;;  %s65_s13 = smov 32   ;;  %s66_s14 = smov [#allocation2]   ;;  %vm23_vm1 = vcmask 523520  }
   0x4   :  { %19 = vrot.lane.b32.xlu0 %v12_v0, %s65_s13  ;;  %s31_s15 = sshll.u32 %s66_s14, 4  ;;  %s32_s15 = int_to_ptr.vmem [resolvable:$true] %s31_s15 }
   0x5   :  { %16 = vst.msk [vmem:[#allocation2] sm:$0xff] %vm15_vm0, %v14_v2  ;;  %s41_s16 = scalar_lea.vmem %s32_s15, 128  ;;  %p46_p1 = scmp.lt.s32.totalorder %s32_s15, %s32_s15 }
   0x6   :  { %p42_p0 = scmp.ne.s32.totalorder %s32_s15, %s41_s16  ;;  %p47_p2 = scmp.lt.s32.totalorder %s41_s16, %s41_s16 }
   0x8   :  { %p48_p3 = por %p47_p2, %p46_p1 }
   0xa   :  { %p49_p4 = pnand %p48_p3, %p42_p0 }
  0x76   :  { %v20_v3 = vpop.permute.xlu0 %19 }
  0x77   :  { %v22_v4 = vadd.f32 %v20_v3, %v13_v1 }
  0x79   :  { %24 = vst.msk [vmem:[#allocation2] sm:$0xff] %vm23_vm1, %v22_v4 }
  0x7a   :  { %52 = shalt.err (!%p49_p4)
}
  0x7b   :  { %s53_s17 = scalar_lea.hbm %s102_s2, 128 }
  0x7c   :  { %p54_p5 = scmp.ne.s32.totalorder %s102_s2, %s53_s17  ;;  %p57_p6 = scmp.lt.u32.totalorder %s53_s17, %s102_s2 }
  0x7e   :  { %p59_p7 = pnand %p57_p6, %p54_p5 }
  0x80   :  { %62 = shalt.err (!%p59_p7)
}
  0x81   :  { %34 = dma.vmem_to_hbm [thread:$0]  %s32_s15, 128, %s102_s2, [#allocation3]  }
  0x82   :  { %63 = dma.done.wait [#allocation3], 128  }
  0x83   :  { %64 = vsyncadd [#allocation3], 4294967168 }
  0x84   :  { %38 = vsyncpa [#allocation3], 1 }

</bundles_post_ra>
